<compile_context>
chip_gen: v6e
topology: v6e:2x2x1
jax: 0.10.0
libtpu: 0.0.40
codegen_flags: <defaults>
</compile_context>

<pallas_src>
import jax
import jax.numpy as jnp
from jax import lax
from jax.experimental import pallas as pl
from jax.experimental.pallas import tpu as pltpu


# ----------------------------------------------------------------------------
# Hardware-aware helpers
# ----------------------------------------------------------------------------
def _vmem_capacity_bytes():
    """Physical VMEM per TensorCore (128 MiB v5e/v6e, 64 MiB v7x)."""
    try:
        return int(pltpu.get_tpu_info().vmem_capacity_bytes)
    except Exception:
        return 64 * 1024 * 1024          # conservative (v7x-sized) fallback


def _pick_tile(dim, cands=(512, 256, 128)):
    """Largest candidate tile dividing `dim`, else the full dim."""
    if dim <= cands[0]:
        return dim
    for c in cands:
        if dim % c == 0:
            return c
    # TODO(synk): pad ragged lengths instead of falling back to a full block.
    return dim


# ----------------------------------------------------------------------------
# Linear layer (x @ W + b), tiled over M / N / K with an f32 accumulator
# ----------------------------------------------------------------------------
def _linear_kernel(x_ref, w_ref, b_ref, o_ref, acc_ref):
    @pl.when(pl.program_id(2) == 0)
    def _():
        acc_ref[...] = jnp.zeros_like(acc_ref)

    acc_ref[...] += jnp.dot(x_ref[...], w_ref[...],
                            preferred_element_type=jnp.float32)

    @pl.when(pl.program_id(2) == pl.num_programs(2) - 1)
    def _():
        o_ref[...] = (acc_ref[...] + b_ref[...].astype(jnp.float32)
                      ).astype(o_ref.dtype)


def linear(x, w, b):
    """x: (M, K), w: (K, N), b: (N,)  ->  x @ w + b  of shape (M, N)."""
    M, K = x.shape
    N = w.shape[1]
    TM = _pick_tile(M)
    TN = _pick_tile(N)
    TK = _pick_tile(K, (1024, 512, 256))
    vmem_cap = _vmem_capacity_bytes()
    b2 = b.reshape(1, N)
    return pl.pallas_call(
        _linear_kernel,
        out_shape=jax.ShapeDtypeStruct((M, N), x.dtype),
        grid_spec=pltpu.PrefetchScalarGridSpec(
            num_scalar_prefetch=0,
            grid=(M // TM, N // TN, K // TK),
            in_specs=[
                pl.BlockSpec((TM, TK), lambda i, j, k: (i, k)),
                pl.BlockSpec((TK, TN), lambda i, j, k: (k, j)),
                pl.BlockSpec((1, TN), lambda i, j, k: (0, j)),
            ],
            out_specs=pl.BlockSpec((TM, TN), lambda i, j, k: (i, j)),
            scratch_shapes=[pltpu.VMEM((TM, TN), jnp.float32)],
        ),
        compiler_params=pltpu.CompilerParams(
            dimension_semantics=("parallel", "parallel", "arbitrary"),
            vmem_limit_bytes=vmem_cap // 2,
        ),
    )(x, w, b2)


# ----------------------------------------------------------------------------
# Fused MHA attention kernel (no score output, (B, L, d_model) layout)
# ----------------------------------------------------------------------------
def _make_fused_mha_kernel(n_heads, d_head, e, has_mask, mask_per_head):
    H, D = n_heads, d_head

    def _attend_head(q, k, v, mask):
        # q: (TQ, D); k, v: (Lk, D).  1/sqrt(D) is folded into the q projection.
        s = lax.dot_general(q, k, dimension_numbers=(((1,), (1,)), ((), ())),
                            preferred_element_type=jnp.float32)
        if mask is not None:
            # PyTorch: score.masked_fill(mask == 0, -e)   (-e, NOT -inf)
            s = jnp.where(mask == 0, jnp.float32(-e), s)
        s = s - jnp.max(s, axis=-1, keepdims=True)
        p = jnp.exp(s)
        denom = jnp.sum(p, axis=-1, keepdims=True)
        o = jnp.dot(p.astype(v.dtype), v, preferred_element_type=jnp.float32)
        # Deferred normalisation: a (TQ, D) multiply instead of (TQ, Lk), with
        # the reciprocal on the (otherwise idle) EUP slot.
        return o * pl.reciprocal(denom, approx=True)

    def _body(q_ref, k_ref, v_ref, m_ref, o_ref):
        m = m_ref[...] if m_ref is not None else None
        for h in range(H):                 # static unroll over heads
            lo, hi = h * D, (h + 1) * D
            mask_h = None
            if m is not None:
                mask_h = m[h] if mask_per_head else m[0]
            o_h = _attend_head(q_ref[:, lo:hi], k_ref[:, lo:hi],
                               v_ref[:, lo:hi], mask_h)
            o_ref[:, lo:hi] = o_h.astype(o_ref.dtype)

    if has_mask:
        def kernel(q_ref, k_ref, v_ref, m_ref, o_ref):
            _body(q_ref, k_ref, v_ref, m_ref, o_ref)
    else:
        def kernel(q_ref, k_ref, v_ref, o_ref):
            _body(q_ref, k_ref, v_ref, None, o_ref)
    return kernel


def _fused_mha_attention(n_heads, qp=None, kp=None, vp=None, qkv=None,
                         mask=None, e=1e-12):
    """No-score attention over (B, L, d_model)-layout projection outputs.

    Either (qp, kp, vp), each (B, L*, d_model), or `qkv` packed as
    (B, L, 3*d_model) (self-attention, requires d_model % 128 == 0).
    Returns the context in (B, Lq, d_model) layout (no concat transpose).
    """
    if qkv is not None:
        B, Lq, three_dm = qkv.shape
        d_model = three_dm // 3
        Lk = Lq
        dtype = qkv.dtype
        q_arr = k_arr = v_arr = qkv
        q_col, k_col, v_col = 0, 1, 2
    else:
        B, Lq, d_model = qp.shape
        Lk = kp.shape[1]
        dtype = qp.dtype
        q_arr, k_arr, v_arr = qp, kp, vp
        q_col = k_col = v_col = 0

    H = n_heads
    D = d_model // H
    has_mask = mask is not None
    itemsize = jnp.dtype(dtype).itemsize
    vmem_cap = _vmem_capacity_bytes()
    budget = vmem_cap // 4

    TQ = _pick_tile(Lq)

    def vmem_est(tq):
        kv_bytes = 2 * Lk * d_model * itemsize       # K + V blocks
        qo_bytes = 2 * tq * d_model * itemsize       # q + context blocks
        soft = 4 * tq * Lk * 4                       # live f32 score/prob tiles
        return 2 * (kv_bytes + qo_bytes) + soft      # ~double-buffered DMAs

    while vmem_est(TQ) > budget and TQ > 128 and TQ % 16 == 0:
        TQ //= 2
    # TODO(synk): tile K/V along Lk (online-softmax accumulation) when the
    # (Lk, d_model) K/V blocks alone exceed the VMEM budget (very long seqs).

    grid = (B, Lq // TQ)
    q_spec = pl.BlockSpec((None, TQ, d_model), lambda b, qi, c=q_col: (b, qi, c))
    k_spec = pl.BlockSpec((None, Lk, d_model), lambda b, qi, c=k_col: (b, 0, c))
    v_spec = pl.BlockSpec((None, Lk, d_model), lambda b, qi, c=v_col: (b, 0, c))
    out_spec = pl.BlockSpec((None, TQ, d_model), lambda b, qi: (b, qi, 0))

    in_specs = [q_spec, k_spec, v_spec]
    args = [q_arr, k_arr, v_arr]

    mask_per_head = False
    mask_bytes = 0
    if has_mask:
        m = jnp.asarray(mask)
        while m.ndim < 4:
            m = m[None]
        Bm, Hm, Lqm, Lkm = m.shape
        if Lkm != Lk:
            m = jnp.broadcast_to(m, (Bm, Hm, Lqm, Lk))
        m = m.astype(jnp.int8)            # keep broadcast dims un-expanded
        mask_per_head = Hm > 1
        lqm_blk = TQ if Lqm == Lq else 1

        def m_index(b, qi, _Bm=Bm, _Lqm=Lqm):
            return (b if _Bm > 1 else 0, 0, qi if _Lqm == Lq else 0, 0)

        in_specs.append(pl.BlockSpec((None, Hm, lqm_blk, Lk), m_index))
        args.append(m)
        mask_bytes = int(m.size)

    cost = pl.CostEstimate(
        flops=int(4 * B * H * Lq * Lk * D),
        transcendentals=int(B * H * Lq * Lk),
        bytes_accessed=int(itemsize * (2 * B * Lq * d_model
                                       + 2 * B * Lk * d_model) + mask_bytes),
    )

    kernel = _make_fused_mha_kernel(H, D, e, has_mask, mask_per_head)
    return pl.pallas_call(
        kernel,
        out_shape=jax.ShapeDtypeStruct((B, Lq, d_model), dtype),
        grid_spec=pltpu.PrefetchScalarGridSpec(
            num_scalar_prefetch=0,
            grid=grid,
            in_specs=in_specs,
            out_specs=out_spec,
        ),
        compiler_params=pltpu.CompilerParams(
            dimension_semantics=("parallel", "parallel"),
            vmem_limit_bytes=vmem_cap // 2,
        ),
        cost_estimate=cost,
    )(*args)


# ----------------------------------------------------------------------------
# Standalone ScaleDotProductAttention (returns context AND score)
# ----------------------------------------------------------------------------
def _make_sdpa_kernel(scale, e, has_mask):
    """One (batch, head-group, q-tile) block.
    q: (HB, TQ, D); k, v: (HB, Lk, D); mask: (1|HB, 1|TQ, Lk)."""

    def _attend(q, k, v, mask):
        s = lax.dot_general(q, k, dimension_numbers=(((2,), (2,)), ((0,), (0,))),
                            preferred_element_type=jnp.float32) * scale
        if mask is not None:
            s = jnp.where(mask == 0, jnp.float32(-e), s)
        s = s - jnp.max(s, axis=-1, keepdims=True)
        p = jnp.exp(s)
        denom = jnp.sum(p, axis=-1, keepdims=True)
        p = p * pl.reciprocal(denom, approx=False)   # exact: p is an output
        o = lax.dot_general(p.astype(v.dtype), v,
                            dimension_numbers=(((2,), (1,)), ((0,), (0,))),
                            preferred_element_type=jnp.float32)
        return o, p

    if has_mask:
        def kernel(q_ref, k_ref, v_ref, m_ref, out_ref, score_ref):
            o, p = _attend(q_ref[...], k_ref[...], v_ref[...], m_ref[...])
            out_ref[...] = o.astype(out_ref.dtype)
            score_ref[...] = p.astype(score_ref.dtype)
    else:
        def kernel(q_ref, k_ref, v_ref, out_ref, score_ref):
            o, p = _attend(q_ref[...], k_ref[...], v_ref[...], None)
            out_ref[...] = o.astype(out_ref.dtype)
            score_ref[...] = p.astype(score_ref.dtype)
    return kernel


def scale_dot_product_attention(q, k, v, mask=None, e=1e-12):
    """Pallas equivalent of ScaleDotProductAttention.forward.

    q: (B, H, Lq, D); k, v: (B, H, Lk, D); mask broadcastable to
    (B, H, Lq, Lk).  Returns (context, score), like the PyTorch module.
    """
    B, H, Lq, D = q.shape
    Lk = k.shape[2]
    scale = 1.0 / (D ** 0.5)
    has_mask = mask is not None
    itemsize = jnp.dtype(q.dtype).itemsize
    vmem_cap = _vmem_capacity_bytes()
    budget = vmem_cap // 4

    TQ = _pick_tile(Lq)

    def vmem_est(hb, tq):
        kv_bytes = 2 * hb * Lk * D * itemsize
        qo_bytes = 2 * hb * tq * D * itemsize
        score_out = hb * tq * Lk * itemsize
        score_f32 = 3 * hb * tq * Lk * 4
        return 2 * (kv_bytes + qo_bytes + score_out) + score_f32

    HB = H
    while HB > 1 and vmem_est(HB, TQ) > budget:
        HB -= 1
        while H % HB != 0:
            HB -= 1
    while vmem_est(HB, TQ) > budget and TQ > 128 and TQ % 16 == 0:
        TQ //= 2

    grid = (B, H // HB, Lq // TQ)
    q_spec = pl.BlockSpec((None, HB, TQ, D), lambda b, h, qi: (b, h, qi, 0))
    kv_spec = pl.BlockSpec((None, HB, Lk, D), lambda b, h, qi: (b, h, 0, 0))
    out_spec = pl.BlockSpec((None, HB, TQ, D), lambda b, h, qi: (b, h, qi, 0))
    score_spec = pl.BlockSpec((None, HB, TQ, Lk), lambda b, h, qi: (b, h, qi, 0))

    in_specs = [q_spec, kv_spec, kv_spec]
    args = [q, k, v]
    mask_bytes = 0
    if has_mask:
        m = jnp.asarray(mask)
        while m.ndim < 4:
            m = m[None]
        Bm, Hm, Lqm, Lkm = m.shape
        if Lkm != Lk:
            m = jnp.broadcast_to(m, (Bm, Hm, Lqm, Lk))
        m = m.astype(jnp.int8)
        hm_blk = HB if Hm == H else 1
        lqm_blk = TQ if Lqm == Lq else 1

        def m_index(b, h, qi, _Bm=Bm, _Hm=Hm, _Lqm=Lqm):
            return (b if _Bm > 1 else 0,
                    h if _Hm == H else 0,
                    qi if _Lqm == Lq else 0,
                    0)

        in_specs.append(pl.BlockSpec((None, hm_blk, lqm_blk, Lk), m_index))
        args.append(m)
        mask_bytes = int(m.size)

    cost = pl.CostEstimate(
        flops=int(4 * B * H * Lq * Lk * D),
        transcendentals=int(B * H * Lq * Lk),
        bytes_accessed=int(itemsize * (q.size + k.size + v.size
                                       + B * H * Lq * D + B * H * Lq * Lk)
                           + mask_bytes),
    )

    kernel = _make_sdpa_kernel(scale, e, has_mask)
    out, score = pl.pallas_call(
        kernel,
        out_shape=(jax.ShapeDtypeStruct((B, H, Lq, D), q.dtype),
                   jax.ShapeDtypeStruct((B, H, Lq, Lk), q.dtype)),
        grid_spec=pltpu.PrefetchScalarGridSpec(
            num_scalar_prefetch=0,
            grid=grid,
            in_specs=in_specs,
            out_specs=[out_spec, score_spec],
        ),
        compiler_params=pltpu.CompilerParams(
            dimension_semantics=("parallel", "parallel", "parallel"),
            vmem_limit_bytes=vmem_cap // 2,
        ),
        cost_estimate=cost,
    )(*args)
    return out, score


# ----------------------------------------------------------------------------
# MultiheadAttention forward
# ----------------------------------------------------------------------------
def init_mha_params(key, d_model, dtype=jnp.float32):
    """nn.Linear-style params; weights stored (in, out) so projection is x@w+b."""
    ks = jax.random.split(key, 8)
    bound = 1.0 / (d_model ** 0.5)

    def w(kk):
        return jax.random.uniform(kk, (d_model, d_model), dtype, -bound, bound)

    def b(kk):
        return jax.random.uniform(kk, (d_model,), dtype, -bound, bound)

    return dict(w_q=w(ks[0]), b_q=b(ks[1]), w_k=w(ks[2]), b_k=b(ks[3]),
                w_v=w(ks[4]), b_v=b(ks[5]), w_c=w(ks[6]), b_c=b(ks[7]))


def multihead_attention(q, k, v, params, n_heads, mask=None, e=1e-12):
    """Pallas equivalent of MultiheadAttention.forward (returns the output)."""
    B, Lq, d_model = q.shape
    Lk = k.shape[1]
    d_tensor = d_model // n_heads
    scale = jnp.asarray(1.0 / (d_tensor ** 0.5), params["w_q"].dtype)

    # Fold the 1/sqrt(d_head) softmax scale into the q projection so the
    # attention kernel never multiplies the (TQ, Lk) score tile by it.
    w_q = params["w_q"] * scale
    b_q = params["b_q"] * scale

    if (q is k) and (k is v) and (d_model % 128 == 0):
        # Self-attention: one fused QKV matmul (activation read once, wide N),
        # consumed directly via column-offset BlockSpecs (no slice copies).
        w_qkv = jnp.concatenate([w_q, params["w_k"], params["w_v"]], axis=1)
        b_qkv = jnp.concatenate([b_q, params["b_k"], params["b_v"]], axis=0)
        qkv = linear(q.reshape(B * Lq, d_model), w_qkv, b_qkv)
        ctx = _fused_mha_attention(n_heads, qkv=qkv.reshape(B, Lq, 3 * d_model),
                                   mask=mask, e=e)
    else:
        qp = linear(q.reshape(B * Lq, d_model), w_q, b_q).reshape(B, Lq, d_model)
        kp = linear(k.reshape(B * Lk, d_model), params["w_k"],
                    params["b_k"]).reshape(B, Lk, d_model)
        vp = linear(v.reshape(B * Lk, d_model), params["w_v"],
                    params["b_v"]).reshape(B, Lk, d_model)
        ctx = _fused_mha_attention(n_heads, qp=qp, kp=kp, vp=vp, mask=mask, e=e)

    # ctx is already in (B, Lq, d_model) layout -- no concat transpose.
    out = linear(ctx.reshape(B * Lq, d_model), params["w_c"], params["b_c"])
    return out.reshape(B, Lq, d_model)


# ----------------------------------------------------------------------------
# Pure-JAX references
# ----------------------------------------------------------------------------
def _sdpa_reference(q, k, v, mask=None, e=1e-12):
    d = k.shape[-1]
    s = jnp.einsum("bhqd,bhkd->bhqk", q, k) / (d ** 0.5)
    if mask is not None:
        m = jnp.asarray(mask)
        while m.ndim < 4:
            m = m[None]
        s = jnp.where(m == 0, -e, s)
    p = jax.nn.softmax(s, axis=-1)
    return jnp.einsum("bhqk,bhkd->bhqd", p, v), p


def _mha_reference(q, k, v, params, n_heads, mask=None, e=1e-12):
    d_model = q.shape[-1]
    d_t = d_model // n_heads

    def split(x):
        b, l, _ = x.shape
        return x.reshape(b, l, n_heads, d_t).transpose(0, 2, 1, 3)

    qp = q @ params["w_q"] + params["b_q"]
    kp = k @ params["w_k"] + params["b_k"]
    vp = v @ params["w_v"] + params["b_v"]
    out, _ = _sdpa_reference(split(qp), split(kp), split(vp), mask=mask, e=e)
    b, _, lq, _ = out.shape
    concat = out.transpose(0, 2, 1, 3).reshape(b, lq, d_model)
    return concat @ params["w_c"] + params["b_c"]


if __name__ == "__main__":
    key = jax.random.PRNGKey(0)
    # The fused MHA kernel uses pl.reciprocal(approx=True) (deferred softmax
    # normalisation on the EUP), so MHA checks use a slightly looser tolerance.
    MHA_TOL = dict(atol=5e-3, rtol=5e-3)

    # --- MultiheadAttention: distinct q/k/v, d_model=32, n_heads=4 ----------
    B, L, d_model, n_heads = 2, 8, 32, 4
    kq, kk, kv, kp, km, kx, kp2 = jax.random.split(key, 7)
    q = jax.random.normal(kq, (B, L, d_model), dtype=jnp.float32)
    k = jax.random.normal(kk, (B, L, d_model), dtype=jnp.float32)
    v = jax.random.normal(kv, (B, L, d_model), dtype=jnp.float32)
    params = init_mha_params(kp, d_model)

    y = multihead_attention(q, k, v, params, n_heads)
    jax.block_until_ready(y)
    assert jnp.allclose(y, _mha_reference(q, k, v, params, n_heads), **MHA_TOL)

    # Masked (padding-style mask broadcast over heads: (B, 1, L, L)).
    mask = (jax.random.uniform(km, (B, 1, L, L)) > 0.3).astype(jnp.int32)
    y_m = multihead_attention(q, k, v, params, n_heads, mask=mask)
    jax.block_until_ready(y_m)
    assert jnp.allclose(y_m, _mha_reference(q, k, v, params, n_heads, mask=mask),
                        **MHA_TOL)

    # --- Cross-attention (Lq != Lk) ------------------------------------------
    Lk_len = 16
    k2 = jax.random.normal(kk, (B, Lk_len, d_model), dtype=jnp.float32)
    v2 = jax.random.normal(kv, (B, Lk_len, d_model), dtype=jnp.float32)
    y_x = multihead_attention(q, k2, v2, params, n_heads)
    jax.block_until_ready(y_x)
    assert jnp.allclose(y_x, _mha_reference(q, k2, v2, params, n_heads), **MHA_TOL)

    # --- Self-attention, d_model % 128 == 0: fused QKV + packed consumption --
    d_model2, n_heads2 = 128, 2
    x = jax.random.normal(kx, (B, L, d_model2), dtype=jnp.float32)
    params2 = init_mha_params(kp2, d_model2)
    y_s = multihead_attention(x, x, x, params2, n_heads2, mask=mask)
    jax.block_until_ready(y_s)
    assert jnp.allclose(y_s, _mha_reference(x, x, x, params2, n_heads2, mask=mask),
                        **MHA_TOL)

    # --- Standalone ScaleDotProductAttention (returns context + score) ------
    d_t = d_model // n_heads
    qh = q.reshape(B, L, n_heads, d_t).transpose(0, 2, 1, 3)
    kh = k.reshape(B, L, n_heads, d_t).transpose(0, 2, 1, 3)
    vh = v.reshape(B, L, n_heads, d_t).transpose(0, 2, 1, 3)

    out, score = scale_dot_product_attention(qh, kh, vh)
    jax.block_until_ready((out, score))
    ref_out, ref_score = _sdpa_reference(qh, kh, vh)
    assert jnp.allclose(out, ref_out, atol=1e-5, rtol=1e-5)
    assert jnp.allclose(score, ref_score, atol=1e-5, rtol=1e-5)

    out_m, score_m = scale_dot_product_attention(qh, kh, vh, mask=mask)
    jax.block_until_ready((out_m, score_m))
    ref_out_m, ref_score_m = _sdpa_reference(qh, kh, vh, mask=mask)
    assert jnp.allclose(out_m, ref_out_m, atol=1e-5, rtol=1e-5)
    assert jnp.allclose(score_m, ref_score_m, atol=1e-5, rtol=1e-5)

    print("KERNEL_OK")
</pallas_src>

<mosaic_0001>
module attributes {stable_mosaic.version = 11 : i64} {
  func.func @_linear_kernel(%arg0: i32, %arg1: i32, %arg2: i32, %arg3: memref<16x32xf32, #tpu.memory_space<vmem>>, %arg4: memref<32x32xf32, #tpu.memory_space<vmem>>, %arg5: memref<1x32xf32, #tpu.memory_space<vmem>>, %arg6: memref<16x32xf32, #tpu.memory_space<vmem>>, %arg7: memref<16x32xf32, #tpu.memory_space<vmem>>) attributes {dimension_semantics = [#tpu.dimension_semantics<parallel>, #tpu.dimension_semantics<parallel>, #tpu.dimension_semantics<arbitrary>], iteration_bounds = array<i64: 1, 1, 1>, scalar_prefetch = 0 : i64, scratch_operands = 1 : i64, tpu.core_type = #tpu.core_type<tc>, window_params = [{transform_indices = @transform_0, window_bounds = array<i64: 16, 32>}, {transform_indices = @transform_1, window_bounds = array<i64: 32, 32>}, {transform_indices = @transform_2, window_bounds = array<i64: 1, 32>}, {transform_indices = @transform_3, window_bounds = array<i64: 16, 32>}]} {
    %c0_i32 = arith.constant 0 : i32
    %0 = arith.cmpi eq, %arg2, %c0_i32 : i32
    %1 = arith.extui %0 : i1 to i32
    %c0_i32_0 = arith.constant 0 : i32
    %2 = arith.cmpi ne, %1, %c0_i32_0 : i32
    scf.if %2 {
      %cst_10 = arith.constant 0.000000e+00 : f32
      %12 = vector.broadcast %cst_10 : f32 to vector<16x32xf32>
      %c0_11 = arith.constant 0 : index
      %c0_12 = arith.constant 0 : index
      %13 = vector.load %arg7[%c0_11, %c0_12] : memref<16x32xf32, #tpu.memory_space<vmem>>, vector<16x32xf32>
      tpu.vector_store %arg7[%c0_11, %c0_12], %12 {strides = array<i32>} : memref<16x32xf32, #tpu.memory_space<vmem>>, vector<16x32xf32>,
    } else {
    }
    %c0 = arith.constant 0 : index
    %c0_1 = arith.constant 0 : index
    %3 = vector.load %arg7[%c0, %c0_1] : memref<16x32xf32, #tpu.memory_space<vmem>>, vector<16x32xf32>
    %c0_2 = arith.constant 0 : index
    %c0_3 = arith.constant 0 : index
    %4 = vector.load %arg3[%c0_2, %c0_3] : memref<16x32xf32, #tpu.memory_space<vmem>>, vector<16x32xf32>
    %c0_4 = arith.constant 0 : index
    %c0_5 = arith.constant 0 : index
    %5 = vector.load %arg4[%c0_4, %c0_5] : memref<32x32xf32, #tpu.memory_space<vmem>>, vector<32x32xf32>
    %cst = arith.constant dense<0.000000e+00> : vector<16x32xf32>
    %6 = tpu.matmul %4, %5, %cst {dimension_numbers = #tpu.dot_dimension_numbers<[1], [0], [0], [1], [0, 0, 1, 1], [], []>} : vector<16x32xf32>, vector<32x32xf32>, vector<16x32xf32> -> vector<16x32xf32>
    %7 = arith.addf %3, %6 : vector<16x32xf32>
    %c0_6 = arith.constant 0 : index
    %c0_7 = arith.constant 0 : index
    %8 = vector.load %arg7[%c0_6, %c0_7] : memref<16x32xf32, #tpu.memory_space<vmem>>, vector<16x32xf32>
    tpu.vector_store %arg7[%c0_6, %c0_7], %7 {strides = array<i32>} : memref<16x32xf32, #tpu.memory_space<vmem>>, vector<16x32xf32>,
    %c0_i32_8 = arith.constant 0 : i32
    %9 = arith.cmpi eq, %arg2, %c0_i32_8 : i32
    %10 = arith.extui %9 : i1 to i32
    %c0_i32_9 = arith.constant 0 : i32
    %11 = arith.cmpi ne, %10, %c0_i32_9 : i32
    scf.if %11 {
      %c0_10 = arith.constant 0 : index
      %c0_11 = arith.constant 0 : index
      %12 = vector.load %arg7[%c0_10, %c0_11] : memref<16x32xf32, #tpu.memory_space<vmem>>, vector<16x32xf32>
      %c0_12 = arith.constant 0 : index
      %c0_13 = arith.constant 0 : index
      %13 = vector.load %arg5[%c0_12, %c0_13] : memref<1x32xf32, #tpu.memory_space<vmem>>, vector<1x32xf32>
      %14 = vector.broadcast %13 : vector<1x32xf32> to vector<16x32xf32>
      %15 = arith.addf %12, %14 : vector<16x32xf32>
      %c0_14 = arith.constant 0 : index
      %c0_15 = arith.constant 0 : index
      %16 = vector.load %arg6[%c0_14, %c0_15] : memref<16x32xf32, #tpu.memory_space<vmem>>, vector<16x32xf32>
      tpu.vector_store %arg6[%c0_14, %c0_15], %15 {strides = array<i32>} : memref<16x32xf32, #tpu.memory_space<vmem>>, vector<16x32xf32>,
    } else {
    }
    return
  }
  func.func @transform_0(%arg0: i32, %arg1: i32, %arg2: i32) -> (i32, i32) {
    %c0_i32 = arith.constant 0 : i32
    return %arg0, %arg2 : i32, i32
  }
  func.func @transform_1(%arg0: i32, %arg1: i32, %arg2: i32) -> (i32, i32) {
    %c0_i32 = arith.constant 0 : i32
    return %arg2, %arg1 : i32, i32
  }
  func.func @transform_2(%arg0: i32, %arg1: i32, %arg2: i32) -> (i32, i32) {
    %c0_i32 = arith.constant 0 : i32
    %c0_i32_0 = arith.constant 0 : i32
    return %c0_i32, %arg1 : i32, i32
  }
  func.func @transform_3(%arg0: i32, %arg1: i32, %arg2: i32) -> (i32, i32) {
    %c0_i32 = arith.constant 0 : i32
    return %arg0, %arg1 : i32, i32
  }
}

</mosaic_0001>

<bundles_post_ra>
// kernel: tpu_custom_call.1
= control target key start
LH: loop header
LB: loop body
LE: loop exit
PB: predicated region body
PF: predicated region fallthrough
CT: control target
= control target key end

     0   :  { %8 = vsyncpa [#allocation4], 0  ;;  %s325_s0 = inlined_call_operand.hbm [shape: f32[16,32], index: 0, kind: input, shape index: {}]   ;;  %s326_s1 = inlined_call_operand.hbm [shape: f32[32,32], index: 1, kind: input, shape index: {}]   ;;  %s327_s2 = inlined_call_operand.vmem [shape: f32[1,32], index: 2, kind: input, shape index: {}]   ;;  %s328_s3 = inlined_call_operand.hbm [shape: f32[16,32], index: 3, kind: output, shape index: {}]  }
   0x1   :  { %9 = vsyncpa [#allocation7], 0 }
   0x2   :  { %10 = vsyncpa [#allocation5], 0  ;;  %s270_s12 = smov [#allocation3]  }
   0x3   :  { %s16_s13 = sshll.u32 %s270_s12, 4  ;;  %s17_s13 = int_to_ptr.vmem [resolvable:$true] %s16_s13 }
   0x4   :  { %s212_s14 = scalar_lea.vmem %s17_s13, 256  ;;  %p217_p1 = scmp.lt.s32.totalorder %s17_s13, %s17_s13 }
   0x5   :  { %p213_p0 = scmp.ne.s32.totalorder %s17_s13, %s212_s14  ;;  %p218_p2 = scmp.lt.s32.totalorder %s212_s14, %s212_s14 }
   0x7   :  { %p219_p3 = por %p218_p2, %p217_p1 }
   0x9   :  { %p220_p4 = pnand %p219_p3, %p213_p0 }
   0xb   :  { %223 = shalt.err (!%p220_p4)
}
   0xc   :  { %s271_s15 = smov 128   ;;  %s272_s16 = smov 8  }
   0xd   :  { %22 = dma.hbm_to_vmem [thread:$0]  %s325_s0, 256, %s17_s13, [#allocation4], %s271_s15, %s271_s15, %s272_s16  }
   0xe   :  { %s273_s19 = smov [#allocation6]  }
   0xf   :  { %s28_s20 = sshll.u32 %s273_s19, 4  ;;  %s29_s20 = int_to_ptr.vmem [resolvable:$true] %s28_s20 }
  0x10   :  { %s232_s21 = scalar_lea.vmem %s29_s20, 512  ;;  %p237_p6 = scmp.lt.s32.totalorder %s29_s20, %s29_s20 }
  0x11   :  { %p233_p5 = scmp.ne.s32.totalorder %s29_s20, %s232_s21  ;;  %p238_p7 = scmp.lt.s32.totalorder %s232_s21, %s232_s21 }
  0x13   :  { %p239_p8 = por %p238_p7, %p237_p6 }
  0x15   :  { %p240_p9 = pnand %p239_p8, %p233_p5 }
  0x17   :  { %243 = shalt.err (!%p240_p9)
}
  0x18   :  { %34 = dma.hbm_to_vmem [thread:$0]  %s326_s1, 512, %s29_s20, [#allocation7], %s271_s15, %s271_s15, %s272_s16  }
  0x19   :  { %264 = dma.done.wait [#allocation4], 256  }
  0x1a   :  { %265 = vsyncadd [#allocation4], 4294967040 }
  0x1b   :  { %266 = dma.done.wait [#allocation7], 512  }
  0x1c   :  { %267 = vsyncadd [#allocation7], 4294966784  ;;  %vm47_vm0 = vcmask 261120   ;;  %v274_v0 = vmov 0.0   ;;  %v57_v1 = vld [vmem:[#allocation6 + $0x18] sm:$0xff]  ;;  %v56_v2 = vld [vmem:[#allocation6 + $0x10] sm:$0xff] }
  0x1d   :  { %49 = vst.msk [vmem:[#allocation2 + $0x8] sm:$0xff] %vm47_vm0, %v274_v0  ;;  %48 = vst.msk [vmem:[#allocation2] sm:$0xff] %vm47_vm0, %v274_v0  ;;  %187 = vmatprep.subr.mxu0 %v57_v1  ;;  %v52_v3 = vld [vmem:[#allocation3] sm:$0xff]  ;;  %v55_v4 = vld [vmem:[#allocation6 + $0x8] sm:$0xff]  ;;  %s275_s24 = smov [#allocation8]  }
  0x1e   :  { %188 = vmatpush3.msra.mxu0 %v57_v1  ;;  %195 = vmatprep.mubr.msk.f32.mxu0 %vm47_vm0, %v52_v3  ;;  %v54_v5 = vld [vmem:[#allocation6] sm:$0xff]  ;;  %v53_v6 = vld [vmem:[#allocation3 + $0x8] sm:$0xff]  ;;  %s165_s25 = sshll.u32 %s275_s24, 4  ;;  %s166_s25 = int_to_ptr.vmem [resolvable:$true] %s165_s25 }
  0x1f   :  { %189 = vmatprep.subr.mxu0 %v56_v2  ;;  %v180_v13 = vld [vmem:[%s327_s2] ss:$0 sm:$0xff]  ;;  %s244_s26 = scalar_lea.vmem %s166_s25, 256  ;;  %p249_p11 = scmp.lt.s32.totalorder %s166_s25, %s166_s25 }
  0x20   :  { %190 = vmatpush3.msra.mxu0 %v56_v2  ;;  %p245_p10 = scmp.ne.s32.totalorder %s166_s25, %s244_s26  ;;  %p250_p12 = scmp.lt.s32.totalorder %s244_s26, %s244_s26 }
  0x21   :  { %191 = vmatprep.subr.mxu0 %v55_v4 }
  0x22   :  { %192 = vmatpush3.msra.mxu0 %v55_v4  ;;  %p251_p13 = por %p250_p12, %p249_p11 }
  0x23   :  { %193 = vmatprep.subr.mxu0 %v54_v5 }
  0x24   :  { %194 = vmatpush3.msra.mxu0 %v54_v5  ;;  %v51_v7 = vld [vmem:[#allocation2 + $0x8] sm:$0xff]  ;;  %v50_v9 = vld [vmem:[#allocation2] sm:$0xff]  ;;  %p252_p0 = pnand %p251_p13, %p245_p10 }
  0x25   :  { %196 = vmatmul.mubr.msk.f32.vlgmr.msra.gmra.mxu0 %vm47_vm0, %v53_v6 }
  0xe5   :  { %v197_v8 = vpop.f32.mrf.mxu0 }
  0xe6   :  { %v141_v10 = vadd.f32 %v197_v8, %v51_v7 }
  0xe7   :  { %v131_v11 = vpop.f32.mrf.mxu0 }
  0xe8   :  { %143 = vst.msk [vmem:[#allocation2 + $0x8] sm:$0xff] %vm47_vm0, %v141_v10  ;;  %v140_v12 = vadd.f32 %v131_v11, %v50_v9 }
  0xea   :  { %142 = vst.msk [vmem:[#allocation2] sm:$0xff] %vm47_vm0, %v140_v12 }
  0xef   :  { %v148_v14 = vld [vmem:[#allocation2 + $0x8] sm:$0xff] }
  0xf0   :  { %v157_v15 = vadd.f32 %v180_v13, %v148_v14 }
  0xf1   :  { %v147_v16 = vld [vmem:[#allocation2] sm:$0xff] }
  0xf2   :  { %v156_v17 = vadd.f32 %v180_v13, %v147_v16  ;;  %159 = vst.msk [vmem:[#allocation8 + $0x8] sm:$0xff] %vm47_vm0, %v157_v15 }
  0xf4   :  { %158 = vst.msk [vmem:[#allocation8] sm:$0xff] %vm47_vm0, %v156_v17 }
  0xf5   :  { %255 = shalt.err (!%p252_p0)
}
  0xf6   :  { %171 = dma.vmem_to_hbm [thread:$0]  %s166_s25, 256, %s328_s3, [#allocation5], %s271_s15, %s271_s15, %s272_s16  }
  0xf7   :  { %268 = dma.done.wait [#allocation5], 256  }
  0xf8   :  { %269 = vsyncadd [#allocation5], 4294967040 }
  0xf9   :  { %175 = vsyncpa [#allocation4], 1 }
  0xfa   :  { %176 = vsyncpa [#allocation7], 1 }
  0xfb   :  { %177 = vsyncpa [#allocation5], 1 }

</bundles_post_ra>
